<compile_context>
chip_gen: v5e
topology: v5e:2x2
jax: 0.10.0
libtpu: 0.0.40
codegen_flags: <defaults>
</compile_context>

<pallas_src>
import functools

import jax
import jax.numpy as jnp
from jax.experimental import pallas as pl
from jax.experimental.pallas import tpu as pltpu


def _ce_tile_kernel(logits_ref, labels_ref, psum_ref, *, n_rows, tile_rows):
    """One batch tile: sum of per-row cross-entropy losses -> one f32 scalar."""
    i = pl.program_id(0)

    x = logits_ref[...]                      # (tn, C) native dtype (f32/bf16)
    labels = labels_ref[...]                 # (tn, 1) int32 (tail rows undefined)

    # Numerically stable logsumexp. max/subtract in the native dtype (bf16 VPU
    # on v6e/v7x); exp/log and accumulation in f32.
    m = jnp.max(x, axis=-1, keepdims=True)                       # (tn, 1)
    shifted = (x - m).astype(jnp.float32)                        # (tn, C) f32

    # Gather the target-class (shifted) logit via masked sum (no one-hot matmul).
    class_ids = jax.lax.broadcasted_iota(jnp.int32, shifted.shape, 1)
    tgt = jnp.sum(jnp.where(class_ids == labels, shifted, 0.0),
                  axis=-1, keepdims=True)                        # (tn, 1)
    lse = jnp.log(jnp.sum(jnp.exp(shifted), axis=-1, keepdims=True))  # (tn, 1)

    # Mask tail rows of a partial last tile: their logits/labels are undefined,
    # but jnp.where (select) does not propagate NaN/Inf from the unselected arm.
    row = i * tile_rows + jax.lax.broadcasted_iota(jnp.int32, (tile_rows, 1), 0)
    per_row = jnp.where(row < n_rows, lse - tgt, 0.0)            # (tn, 1) f32

    psum_ref[0, 0] = jnp.sum(per_row)        # one f32 partial sum per tile (SMEM)


def _tpu_vmem_capacity_bytes():
    try:
        return int(pltpu.get_tpu_info().vmem_capacity_bytes)
    except Exception:
        return 64 * 1024 * 1024              # assume smallest (v7x per-TC) if unknown


def _pick_tile_rows(n, c, itemsize, budget_bytes):
    """Batch-tile rows sized from honest VMEM accounting (input double buffer
    plus ~6 f32-sized row temps), rounded to the dtype's sublane packing."""
    packing = max(8, 32 // itemsize)         # f32 -> 8, bf16 -> 16, int8/fp8 -> 32
    per_row = 2 * c * itemsize + 6 * c * 4
    tn = budget_bytes // max(1, per_row)
    tn = max(8, min(2048, (tn // packing) * packing))
    # Never exceed the batch (rounded down to 8): at most a standard partial
    # LAST block, never a block bigger than the array -> no host-side padding.
    n_floor8 = max(8, (n // 8) * 8)
    tn = min(tn, n_floor8)
    # Prefer >= 2 tiles so the v7x 2-TC "parallel" split and the DMA pipeline
    # both get work (near-zero cost on single-TC v5e/v6e).
    if n_floor8 >= 16 and tn >= n:
        tn = max(8, (((n_floor8 + 1) // 2 + 7) // 8) * 8)
    return tn


def cross_entropy_loss(logits, labels):
    """Mean cross-entropy. logits: (N, C) float (any dtype), labels: (N,) int."""
    n, c = logits.shape
    itemsize = jnp.dtype(logits.dtype).itemsize

    cap = _tpu_vmem_capacity_bytes()
    budget = max(16 * 1024 * 1024, min(cap // 2, 48 * 1024 * 1024))
    tn = _pick_tile_rows(n, c, itemsize, budget)
    num_tiles = pl.cdiv(n, tn)

    labels2d = labels.astype(jnp.int32).reshape(n, 1)   # tiny; logits untouched

    per_row_bytes = 2 * c * itemsize + 6 * c * 4
    modeled = tn * per_row_bytes
    vmem_limit = int(min(max(32 * 1024 * 1024, 2 * modeled),
                         max(32 * 1024 * 1024, min((cap * 3) // 4, 96 * 1024 * 1024))))

    kernel = functools.partial(_ce_tile_kernel, n_rows=n, tile_rows=tn)

    per_tile = pl.pallas_call(
        kernel,
        out_shape=jax.ShapeDtypeStruct((num_tiles, 1), jnp.float32),
        grid=(num_tiles,),
        in_specs=[
            pl.BlockSpec((tn, c), lambda i: (i, 0)),    # logits tile (native dtype)
            pl.BlockSpec((tn, 1), lambda i: (i, 0)),    # labels tile (int32)
        ],
        out_specs=pl.BlockSpec((1, 1), lambda i: (i, 0),
                               memory_space=pltpu.MemorySpace.SMEM),
        compiler_params=pltpu.CompilerParams(
            dimension_semantics=("parallel",),          # disjoint tiles -> megacore OK
            vmem_limit_bytes=vmem_limit,
        ),
    )(logits, labels2d)

    # Final tiny reduce over num_tiles partial sums; 1/N is a trace-time constant.
    return jnp.sum(per_tile) * (1.0 / n)


def dummy_loss(output, inputs):
    """Pallas equivalent of DummyLoss.forward (device placement is implicit in JAX)."""
    return cross_entropy_loss(output["probs"], inputs["labels"])


if __name__ == "__main__":
    key = jax.random.PRNGKey(0)
    k1, k2, k3, k4 = jax.random.split(key, 4)

    def _reference(lg, lb):
        logp = jax.nn.log_softmax(lg.astype(jnp.float32), axis=-1)
        return -jnp.mean(jnp.take_along_axis(logp, lb[:, None], axis=-1))

    # Case 1: small shape matching the module's toy usage (single tile).
    n1, c1 = 8, 16
    logits1 = jax.random.normal(k1, (n1, c1), dtype=jnp.float32)
    labels1 = jax.random.randint(k2, (n1,), 0, c1, dtype=jnp.int32)
    loss1 = jax.block_until_ready(dummy_loss({"probs": logits1}, {"labels": labels1}))
    ref1 = _reference(logits1, labels1)
    assert jnp.allclose(loss1, ref1, atol=1e-5, rtol=1e-5), (loss1, ref1)

    # Case 2: ragged batch (n % tile != 0) -> multiple tiles + in-kernel tail
    # masking with NO host-side padding copy of the logits.
    n2, c2 = 50, 16
    logits2 = jax.random.normal(k3, (n2, c2), dtype=jnp.float32)
    labels2 = jax.random.randint(k4, (n2,), 0, c2, dtype=jnp.int32)
    loss2 = jax.block_until_ready(dummy_loss({"probs": logits2}, {"labels": labels2}))
    ref2 = _reference(logits2, labels2)
    assert jnp.allclose(loss2, ref2, atol=1e-5, rtol=1e-5), (loss2, ref2)

    print("KERNEL_OK")
</pallas_src>

<mosaic_0001>
module attributes {stable_mosaic.version = 11 : i64} {
  func.func @_ce_tile_kernel(%arg0: i32, %arg1: memref<8x16xf32, #tpu.memory_space<vmem>>, %arg2: memref<8x1xi32, #tpu.memory_space<vmem>>, %arg3: memref<1x1xf32, #tpu.memory_space<smem>>) attributes {dimension_semantics = [#tpu.dimension_semantics<parallel>], iteration_bounds = array<i64: 1>, scalar_prefetch = 0 : i64, scratch_operands = 0 : i64, tpu.core_type = #tpu.core_type<tc>, window_params = [{transform_indices = @transform_0, window_bounds = array<i64: 8, 16>}, {transform_indices = @transform_1, window_bounds = array<i64: 8, 1>}, {transform_indices = @transform_2, window_bounds = array<i64: 1, 1>}]} {
    %c0 = arith.constant 0 : index
    %c0_0 = arith.constant 0 : index
    %0 = vector.load %arg1[%c0, %c0_0] : memref<8x16xf32, #tpu.memory_space<vmem>>, vector<8x16xf32>
    %c0_1 = arith.constant 0 : index
    %c0_2 = arith.constant 0 : index
    %1 = vector.load %arg2[%c0_1, %c0_2] : memref<8x1xi32, #tpu.memory_space<vmem>>, vector<8x1xi32>
    %cst = arith.constant dense<0xFF800000> : vector<8xf32>
    %2 = vector.multi_reduction <maximumf>, %0, %cst [1] : vector<8x16xf32> to vector<8xf32>
    %3 = vector.shape_cast %2 : vector<8xf32> to vector<8x1xf32>
    %4 = vector.broadcast %3 : vector<8x1xf32> to vector<8x16xf32>
    %5 = arith.subf %0, %4 : vector<8x16xf32>
    %6 = tpu.iota {dimensions = array<i32: 1>} : vector<8x16xi32>
    %7 = vector.broadcast %1 : vector<8x1xi32> to vector<8x16xi32>
    %8 = arith.cmpi eq, %6, %7 : vector<8x16xi32>
    %cst_3 = arith.constant 0.000000e+00 : f32
    %9 = vector.broadcast %cst_3 : f32 to vector<8x16xf32>
    %10 = arith.select %8, %5, %9 : vector<8x16xi1>, vector<8x16xf32>
    %cst_4 = arith.constant dense<0.000000e+00> : vector<8xf32>
    %11 = vector.multi_reduction <add>, %10, %cst_4 [1] : vector<8x16xf32> to vector<8xf32>
    %12 = vector.shape_cast %11 : vector<8xf32> to vector<8x1xf32>
    %13 = math.exp %5 : vector<8x16xf32>
    %cst_5 = arith.constant dense<0.000000e+00> : vector<8xf32>
    %14 = vector.multi_reduction <add>, %13, %cst_5 [1] : vector<8x16xf32> to vector<8xf32>
    %15 = vector.shape_cast %14 : vector<8xf32> to vector<8x1xf32>
    %16 = math.log %15 : vector<8x1xf32>
    %c8_i32 = arith.constant 8 : i32
    %17 = arith.muli %arg0, %c8_i32 : i32
    %18 = tpu.iota {dimensions = array<i32: 0>} : vector<8x1xi32>
    %19 = vector.broadcast %17 : i32 to vector<8x1xi32>
    %20 = arith.addi %19, %18 : vector<8x1xi32>
    %c8_i32_6 = arith.constant 8 : i32
    %21 = vector.broadcast %c8_i32_6 : i32 to vector<8x1xi32>
    %22 = arith.cmpi slt, %20, %21 : vector<8x1xi32>
    %23 = arith.subf %16, %12 : vector<8x1xf32>
    %cst_7 = arith.constant 0.000000e+00 : f32
    %24 = vector.broadcast %cst_7 : f32 to vector<8x1xf32>
    %25 = arith.select %22, %23, %24 : vector<8x1xi1>, vector<8x1xf32>
    %26 = vector.shape_cast %25 : vector<8x1xf32> to vector<1x8x1xf32>
    %cst_8 = arith.constant dense<0.000000e+00> : vector<1xf32>
    %27 = vector.multi_reduction <add>, %26, %cst_8 [1, 2] : vector<1x8x1xf32> to vector<1xf32>
    %28 = vector.shape_cast %27 : vector<1xf32> to vector<1x1x1xf32>
    %29 = vector.extract %28[0, 0, 0] : f32 from vector<1x1x1xf32>
    %c0_9 = arith.constant 0 : index
    %c0_10 = arith.constant 0 : index
    %30 = memref.load %arg3[%c0_9, %c0_10] : memref<1x1xf32, #tpu.memory_space<smem>>
    memref.store %29, %arg3[%c0_9, %c0_10] : memref<1x1xf32, #tpu.memory_space<smem>>
    return
  }
  func.func @transform_0(%arg0: i32) -> (i32, i32) {
    %c0_i32 = arith.constant 0 : i32
    %c0_i32_0 = arith.constant 0 : i32
    return %arg0, %c0_i32 : i32, i32
  }
  func.func @transform_1(%arg0: i32) -> (i32, i32) {
    %c0_i32 = arith.constant 0 : i32
    %c0_i32_0 = arith.constant 0 : i32
    return %arg0, %c0_i32 : i32, i32
  }
  func.func @transform_2(%arg0: i32) -> (i32, i32) {
    %c0_i32 = arith.constant 0 : i32
    %c0_i32_0 = arith.constant 0 : i32
    return %arg0, %c0_i32 : i32, i32
  }
}

</mosaic_0001>

<bundles_post_ra>
// kernel: tpu_custom_call.1
= control target key start
LH: loop header
LB: loop body
LE: loop exit
PB: predicated region body
PF: predicated region fallthrough
CT: control target
= control target key end

     0   :  { %vm14_vm0 = vcmask 130048   ;;  %s124_s0 = inlined_call_operand.vmem [shape: f32[8,16], index: 0, kind: input, shape index: {}]   ;;  %s125_s1 = inlined_call_operand.vmem [shape: s32[8,1], index: 1, kind: input, shape index: {}]   ;;  %s126_s2 = inlined_call_operand.hbm [shape: f32[1,1], index: 2, kind: output, shape index: {}]  }
   0x1   :  { %v12_v0 = vld [vmem:[%s124_s0] sm:$0xff] }
   0x2   :  { %7 = vsyncpa [#allocation3], 0  ;;  %v15_v1 = vsel %vm14_vm0, %v12_v0, -inf  ;;  %v95_v2 = vmov 0   ;;  %v13_v3 = vld [vmem:[%s125_s1] sm:$0xff]  ;;  %v19_v9 = vlaneseq  ;;  %vm44_vm2 = vcmask 7168  }
   0x3   :  { %76 = vset.pattern.permute.xlu0 %v95_v2  ;;  %s62_s13 = sshll.u32 %s126_s2, 4  ;;  %s96_s15 = smov [#allocation2]   ;;  %s63_s13 = int_to_ptr.hbm [resolvable:$true] %s62_s13 }
   0x4   :  { %16 = vmax.xlane.f32.xlu0 %v15_v1  ;;  %v20_v10 = vand.u32 127, %v19_v9 }
  0x18   :  { %22 = vperm.xlu0 %76, %v13_v3  }
  0x77   :  { %v17_v4 = vpop.xlane.xlu0 %16 }
  0x78   :  { %v18_v5 = vsub.f32 %v12_v0, %v17_v4 }
  0x7a   :  { %v29_v6 = vmul.f32 1.442695, %v18_v5 }
  0x7c   :  { %77 = vpow2.f32 %v29_v6 }
  0x82   :  { %v78_v7 = vpop.eup %77 }
  0x83   :  { %v31_v8 = vsel %vm14_vm0, %v78_v7, 0.0 }
  0x84   :  { %32 = vadd.xlane.f32.xlu1 %v31_v8 }
  0x8a   :  { %v23_v11 = vpop.permute.xlu0 %22 }
  0x8b   :  { %vm24_vm1 = vcmp.eq.s32.totalorder %v20_v10, %v23_v11 }
  0x8c   :  { %v25_v12 = vsel %vm24_vm1, %v18_v5, 0.0 }
  0x8d   :  { %v26_v13 = vsel %vm14_vm0, %v25_v12, 0.0 }
  0x8e   :  { %27 = vadd.xlane.f32.xlu1 %v26_v13 }
  0xf7   :  { %v33_v14 = vpop.xlane.xlu1 %32 }
  0xf8   :  { %79 = vlog2.f32 %v33_v14 }
  0xfe   :  { %v80_v15 = vpop.eup %79 }
  0xff   :  { %v35_v16 = vmul.f32 0.6931472, %v80_v15 }
 0x101   :  { %v28_v17 = vpop.xlane.xlu1 %27 }
 0x102   :  { %v42_v18 = vsub.f32 %v35_v16, %v28_v17 }
 0x104   :  { %v45_v19 = vsel %vm44_vm2, %v42_v18, 0.0 }
 0x105   :  { %46 = vadd.xlane.f32.xlu2 %v45_v19 }
 0x178   :  { %v47_v20 = vpop.xlane.xlu2 %46 }
 0x179   :  { %v48_v21 = vrot.slane %v47_v20, 4 }
 0x17b   :  { %v49_v22 = vadd.f32 %v48_v21, %v47_v20 }
 0x17d   :  { %v50_v23 = vrot.slane %v49_v22, 2 }
 0x17f   :  { %v51_v24 = vadd.f32 %v50_v23, %v49_v22 }
 0x181   :  { %v52_v25 = vrot.slane %v51_v24, 1 }
 0x183   :  { %v53_v26 = vadd.f32 %v52_v25, %v51_v24 }
 0x185   :  { %72 = vpush %v53_v26 }
 0x1b6   :  { %s73_s14 = spop %72 }
 0x1b7   :  { %56 = sst [smem:[#allocation2]] %s73_s14 }
 0x1b8   :  { %65 = dma.smem_to_hbm %s96_s15, 16, %s63_s13, [#allocation3]  }
 0x1b9   :  { %93 = dma.done.wait [#allocation3], 16  }
 0x1ba   :  { %94 = vsyncadd [#allocation3], 4294967280 }
 0x1bb   :  { %70 = sfence }
 0x1bc   :  { %71 = vsyncpa [#allocation3], 1 }

</bundles_post_ra>
